<compile_context>
chip_gen: v6e
topology: v6e:2x2x1
jax: 0.10.0
libtpu: 0.0.40
codegen_flags: <defaults>
</compile_context>

<pallas_src>
import jax
import jax.numpy as jnp
from jax.experimental import pallas as pl
from jax.experimental.pallas import tpu as pltpu


def _round_up(x, m):
    return ((x + m - 1) // m) * m


# ----------------------------- Pallas kernel --------------------------------
def decoder_lstm_kernel(
        tok_ref,                                   # SMEM (T, B) int32 [prefetch]
        emb_hbm,                                   # HBM  (V, E)
        h0_ref, c0_ref,                            # VMEM (B, Hd)
        enc_ref,                                   # VMEM (L*B, He+1)  [enc | 1]
        sel_ref,                                   # VMEM (B, L*B)  block-diag select
        selT_ref,                                  # VMEM (L*B, B)
        wah_ref, wae_ref, ba_ref, va_ref,          # attention params
        wge_ref, wgc_ref, wgh_ref, bg_ref,         # LSTM gate params (bias fused)
        woh_ref, woc_ref, woe_ref, bo_ref,         # output projection (Vp-padded)
        state_ref,                                 # out VMEM (B, state_w)  [h|c|pad]
        logits_ref,                                # out VMEM (B, Vp) per-step block
        emb_buf, emb_sem, h_sc, c_sc):             # scratch
    t = pl.program_id(0)
    B, Hd = h0_ref.shape
    He = enc_ref.shape[1] - 1
    f32 = jnp.float32

    # ---- decoder state carried in VMEM scratch across the T grid steps
    @pl.when(t == 0)
    def _():
        h_sc[...] = h0_ref[...]
        c_sc[...] = c0_ref[...]

    # ---- embedding lookup: tiny per-row DMA gather straight from HBM
    copies = []
    for b in range(B):
        cp = pltpu.make_async_copy(
            emb_hbm.at[pl.ds(tok_ref[t, b], 1), :],
            emb_buf.at[pl.ds(b, 1), :],
            emb_sem.at[b])
        cp.start()
        copies.append(cp)
    for cp in copies:
        cp.wait()
    embedded = emb_buf[...]                                          # (B, E)

    h = h_sc[...]                                                    # (B, Hd)
    c = c_sc[...]                                                    # (B, Hd)

    # ---- additive attention, entirely in the compact (L*B, *) layout
    hid_part = jnp.dot(h, wah_ref[...],
                       preferred_element_type=f32) + ba_ref[...]     # (B, Hd)
    hid_tiled = jnp.dot(selT_ref[...], hid_part,
                        preferred_element_type=f32)                  # (L*B, Hd)
    enc_part = jnp.dot(enc_ref[...], wae_ref[...],
                       preferred_element_type=f32)                   # (L*B, Hd)
    ah = jnp.tanh(enc_part + hid_tiled)                              # (L*B, Hd)
    scores = jnp.sum(ah * va_ref[...], axis=-1, keepdims=True)       # (L*B, 1)
    # softmax over L per batch element: global-max shift (exact), then a
    # block-diagonal segment-sum matmul; the augmented ones column of enc_ref
    # produces the per-batch denominator in the same matmul.
    e = jnp.exp(scores - jnp.max(scores))                            # (L*B, 1)
    numer_den = jnp.dot(sel_ref[...], e * enc_ref[...],
                        preferred_element_type=f32)                  # (B, He+1)
    inv_den = pl.reciprocal(numer_den[:, He:He + 1], approx=True)    # (B, 1)
    context = numer_den[:, :He] * inv_den                            # (B, He)

    # ---- LSTM cell (PyTorch gate order i, f, g, o; bias = b_ih + b_hh)
    gates = (jnp.dot(embedded, wge_ref[...], preferred_element_type=f32)
             + jnp.dot(context, wgc_ref[...], preferred_element_type=f32)
             + jnp.dot(h, wgh_ref[...], preferred_element_type=f32)
             + bg_ref[...])                                          # (B, 4*Hd)
    i_g = jax.nn.sigmoid(gates[:, 0 * Hd:1 * Hd])
    f_g = jax.nn.sigmoid(gates[:, 1 * Hd:2 * Hd])
    g_g = jnp.tanh(gates[:, 2 * Hd:3 * Hd])
    o_g = jax.nn.sigmoid(gates[:, 3 * Hd:4 * Hd])
    c_new = f_g * c + i_g * g_g
    h_new = o_g * jnp.tanh(c_new)

    # ---- output projection on (h_new | context | embedded); weights pre-split
    # and vocab pre-padded to Vp so the logits store is 128-lane dense.
    logits = (jnp.dot(h_new, woh_ref[...], preferred_element_type=f32)
              + jnp.dot(context, woc_ref[...], preferred_element_type=f32)
              + jnp.dot(embedded, woe_ref[...], preferred_element_type=f32)
              + bo_ref[...])                                         # (B, Vp)

    # ---- carry state + lane-dense stores
    h_sc[...] = h_new
    c_sc[...] = c_new
    logits_ref[...] = logits
    pieces = [h_new, c_new]
    pad_w = state_ref.shape[1] - 2 * Hd
    if pad_w:
        pieces.append(jnp.zeros((B, pad_w), f32))
    state_ref[...] = jnp.concatenate(pieces, axis=1)


# --------------------- one-time parameter preparation ------------------------
def prepare_params(p, weights_dtype=jnp.float32):
    """Transpose / split / pad weights ONCE, outside the per-step path.
    weights_dtype=jnp.bfloat16 halves weight DMA/VMEM on v6e/v7x; kept f32 here
    so the numerics match the f32 reference bit-closely."""
    wd = weights_dtype
    f32 = jnp.float32
    V, E = p["embedding"].shape
    Hd = p["w_hh"].shape[1]
    He = p["w_ih"].shape[1] - E
    Vp = _round_up(V, 128)

    attn_w = p["attn_w"].astype(f32)      # (Hd, Hd+He): [hidden | encoder] cols
    w_ih = p["w_ih"].astype(f32)          # (4Hd, E+He): [embedded | context] cols
    lin_w = p["lin_w"].astype(f32)        # (V, Hd+He+E): [h | context | embedded]

    def pad_v(w):                         # (K, V) -> (K, Vp) zero-padded lanes
        return jnp.zeros((w.shape[0], Vp), f32).at[:, :V].set(w).astype(wd)

    return {
        "emb":    p["embedding"].astype(f32),                        # (V, E) stays in HBM
        "wa_hid": attn_w[:, :Hd].T.astype(wd),                       # (Hd, Hd)
        # extra zero row lets wa_enc consume the ones-augmented encoder matrix
        "wa_enc": jnp.concatenate([attn_w[:, Hd:].T,
                                   jnp.zeros((1, Hd), f32)],
                                  axis=0).astype(wd),                # (He+1, Hd)
        "ba":     p["attn_b"].astype(f32).reshape(1, Hd),
        "va":     p["attn_v"].astype(f32).reshape(1, Hd),
        "wg_e":   w_ih[:, :E].T.astype(wd),                          # (E,  4Hd)
        "wg_c":   w_ih[:, E:].T.astype(wd),                          # (He, 4Hd)
        "wg_h":   p["w_hh"].astype(f32).T.astype(wd),                # (Hd, 4Hd)
        "bg":     (p["b_ih"] + p["b_hh"]).astype(f32).reshape(1, 4 * Hd),
        "wo_h":   pad_v(lin_w[:, :Hd].T),                            # (Hd, Vp)
        "wo_c":   pad_v(lin_w[:, Hd:Hd + He].T),                     # (He, Vp)
        "wo_e":   pad_v(lin_w[:, Hd + He:].T),                       # (E,  Vp)
        "bo":     jnp.zeros((1, Vp), f32).at[:, :V].set(
            p["lin_b"].astype(f32)[None]),
        "dims":   (V, E, He, Hd, Vp),
    }


# ------------------------------- wrappers ------------------------------------
def decoder_lstm_decode(tokens, hidden_state, cell_state, encoder_outputs,
                        prepped):
    """Fused T-step teacher-forced decode in ONE pallas_call.
    tokens: (T, B) int; hidden/cell: (1, B, Hd); encoder_outputs: (L, B, He).
    Returns (logits (T, B, V), h_final (B, Hd), c_final (B, Hd))."""
    V, E, He, Hd, Vp = prepped["dims"]
    T, B = tokens.shape
    L = encoder_outputs.shape[0]
    state_w = _round_up(2 * Hd, 128)
    f32 = jnp.float32

    tok = tokens.astype(jnp.int32)
    h0 = hidden_state[0].astype(f32)
    c0 = cell_state[0].astype(f32)
    enc_flat = encoder_outputs.astype(f32).reshape(L * B, He)   # row l*B+b = enc[l,b]
    enc_aug = jnp.concatenate([enc_flat, jnp.ones((L * B, 1), f32)], axis=1)
    # block-diagonal selection matrices: sel[b, row] = 1 iff row % B == b
    col = jnp.arange(L * B, dtype=jnp.int32) % B
    sel = (jnp.arange(B, dtype=jnp.int32)[:, None] == col[None, :]).astype(f32)
    selT = sel.T

    cst = lambda t, tok: (0, 0)          # resident blocks: DMA'd once, reused each step
    in_specs = [
        pl.BlockSpec(memory_space=pl.ANY),            # embedding table (HBM)
        pl.BlockSpec((B, Hd), cst),                   # h0
        pl.BlockSpec((B, Hd), cst),                   # c0
        pl.BlockSpec((L * B, He + 1), cst),           # enc_aug
        pl.BlockSpec((B, L * B), cst),                # sel
        pl.BlockSpec((L * B, B), cst),                # selT
        pl.BlockSpec((Hd, Hd), cst),                  # wa_hid
        pl.BlockSpec((He + 1, Hd), cst),              # wa_enc (+ zero row)
        pl.BlockSpec((1, Hd), cst),                   # ba
        pl.BlockSpec((1, Hd), cst),                   # va
        pl.BlockSpec((E, 4 * Hd), cst),               # wg_e
        pl.BlockSpec((He, 4 * Hd), cst),              # wg_c
        pl.BlockSpec((Hd, 4 * Hd), cst),              # wg_h
        pl.BlockSpec((1, 4 * Hd), cst),               # bg
        pl.BlockSpec((Hd, Vp), cst),                  # wo_h
        pl.BlockSpec((He, Vp), cst),                  # wo_c
        pl.BlockSpec((E, Vp), cst),                   # wo_e
        pl.BlockSpec((1, Vp), cst),                   # bo
    ]
    out_specs = [
        pl.BlockSpec((B, state_w), cst),                          # final h|c|pad
        pl.BlockSpec((None, B, Vp), lambda t, tok: (t, 0, 0)),    # per-step logits
    ]
    grid_spec = pltpu.PrefetchScalarGridSpec(
        num_scalar_prefetch=1,
        grid=(T,),
        in_specs=in_specs,
        out_specs=out_specs,
        scratch_shapes=[
            pltpu.VMEM((B, E), f32),          # embedding gather buffer
            pltpu.SemaphoreType.DMA((B,)),    # per-row gather semaphores
            pltpu.VMEM((B, Hd), f32),         # h carry
            pltpu.VMEM((B, Hd), f32),         # c carry
        ],
    )

    state_packed, logits_all = pl.pallas_call(
        decoder_lstm_kernel,
        out_shape=(jax.ShapeDtypeStruct((B, state_w), f32),
                   jax.ShapeDtypeStruct((T, B, Vp), f32)),
        grid_spec=grid_spec,
        compiler_params=pltpu.CompilerParams(
            dimension_semantics=("arbitrary",)),
    )(tok, prepped["emb"], h0, c0, enc_aug, sel, selT,
      prepped["wa_hid"], prepped["wa_enc"], prepped["ba"], prepped["va"],
      prepped["wg_e"], prepped["wg_c"], prepped["wg_h"], prepped["bg"],
      prepped["wo_h"], prepped["wo_c"], prepped["wo_e"], prepped["bo"])

    h_fin = state_packed[:, :Hd]
    c_fin = state_packed[:, Hd:2 * Hd]
    logits = logits_all[:, :, :V]
    return logits, h_fin, c_fin


def decoder_lstm_forward(tokens, hidden_state, cell_state, encoder_outputs,
                         prepped):
    """Module-equivalent single decode step (== the T=1 case of the fused kernel).
    Returns (output, softmax, hidden, cell) like the PyTorch module; output is
    the LSTM output, which equals hidden for seq_len=1 / num_layers=1."""
    logits, h_fin, c_fin = decoder_lstm_decode(
        tokens, hidden_state, cell_state, encoder_outputs, prepped)
    return h_fin[None], logits, h_fin[None], c_fin[None]


# --------------------------- pure-JAX reference ------------------------------
def reference_forward(tokens, hidden, cell, enc, p):
    Hd = hidden.shape[2]
    L = enc.shape[0]
    emb = p["embedding"][tokens]                                   # (1, B, E)
    hid_rep = jnp.repeat(hidden, L, axis=0)                        # (L, B, Hd)
    cat = jnp.concatenate([hid_rep, enc], axis=2)
    ah = jnp.tanh(cat @ p["attn_w"].T + p["attn_b"])
    score = (ah @ p["attn_v"].T)[..., 0]                           # (L, B)
    a = jax.nn.softmax(score.T, axis=1)                            # (B, L)
    W = jnp.einsum("bl,lbe->be", a, enc)[None]                     # (1, B, He)
    rnn_in = jnp.concatenate([emb, W], axis=2)[0]
    gates = rnn_in @ p["w_ih"].T + p["b_ih"] + hidden[0] @ p["w_hh"].T + p["b_hh"]
    i = jax.nn.sigmoid(gates[:, :Hd])
    f = jax.nn.sigmoid(gates[:, Hd:2 * Hd])
    g = jnp.tanh(gates[:, 2 * Hd:3 * Hd])
    o = jax.nn.sigmoid(gates[:, 3 * Hd:])
    c_new = f * cell[0] + i * g
    h_new = o * jnp.tanh(c_new)
    lin_in = jnp.concatenate([h_new[None], W, emb], axis=2)
    logits = lin_in @ p["lin_w"].T + p["lin_b"]
    return h_new[None], logits, h_new[None], c_new[None]


# --------------------------------- main --------------------------------------
if __name__ == "__main__":
    # small, module-consistent shapes
    V, E, He, Hd = 24, 16, 32, 32        # dict_size, embedding, enc-hidden, dec-hidden
    B, L, T = 2, 8, 6                    # batch, encoder length, decode steps

    key = jax.random.PRNGKey(0)
    ks = jax.random.split(key, 16)
    s = 0.1
    params = {
        "embedding": jax.random.normal(ks[0], (V, E), jnp.float32) * s,
        "attn_w":    jax.random.normal(ks[1], (Hd, He + Hd), jnp.float32) * s,
        "attn_b":    jax.random.normal(ks[2], (Hd,), jnp.float32) * s,
        "attn_v":    jax.random.normal(ks[3], (1, Hd), jnp.float32) * s,
        "w_ih":      jax.random.normal(ks[4], (4 * Hd, E + He), jnp.float32) * s,
        "w_hh":      jax.random.normal(ks[5], (4 * Hd, Hd), jnp.float32) * s,
        "b_ih":      jax.random.normal(ks[6], (4 * Hd,), jnp.float32) * s,
        "b_hh":      jax.random.normal(ks[7], (4 * Hd,), jnp.float32) * s,
        "lin_w":     jax.random.normal(ks[8], (V, Hd + He + E), jnp.float32) * s,
        "lin_b":     jax.random.normal(ks[9], (V,), jnp.float32) * s,
    }

    tok_seq = jax.random.randint(ks[10], (T, B), 0, V, jnp.int32)
    hidden_state = jax.random.normal(ks[11], (1, B, Hd), jnp.float32)
    cell_state = jax.random.normal(ks[12], (1, B, Hd), jnp.float32)
    encoder_outputs = jax.random.normal(ks[13], (L, B, He), jnp.float32)

    prepped = prepare_params(params)     # one-time weight split / transpose / pad

    # --- 1) module-equivalent single decode step (T == 1) -------------------
    tok0 = tok_seq[:1]                   # (1, B), like the module's `input`
    outs = decoder_lstm_forward(tok0, hidden_state, cell_state,
                                encoder_outputs, prepped)
    outs = jax.block_until_ready(outs)
    refs = reference_forward(tok0, hidden_state, cell_state,
                             encoder_outputs, params)
    for got, ref in zip(outs, refs):
        assert got.shape == ref.shape, (got.shape, ref.shape)
        assert jnp.allclose(got, ref, rtol=2e-3, atol=2e-3), \
            float(jnp.max(jnp.abs(got - ref)))

    # --- 2) fused T-step teacher-forced decode in ONE pallas_call -----------
    logits_seq, h_fin, c_fin = jax.block_until_ready(
        decoder_lstm_decode(tok_seq, hidden_state, cell_state,
                            encoder_outputs, prepped))
    h_r, c_r = hidden_state, cell_state
    ref_logits = []
    for t in range(T):
        _, lg, h_r, c_r = reference_forward(tok_seq[t:t + 1], h_r, c_r,
                                            encoder_outputs, params)
        ref_logits.append(lg[0])
    ref_logits = jnp.stack(ref_logits)
    assert jnp.allclose(logits_seq, ref_logits, rtol=5e-3, atol=5e-3), \
        float(jnp.max(jnp.abs(logits_seq - ref_logits)))
    assert jnp.allclose(h_fin[None], h_r, rtol=5e-3, atol=5e-3), \
        float(jnp.max(jnp.abs(h_fin[None] - h_r)))
    assert jnp.allclose(c_fin[None], c_r, rtol=5e-3, atol=5e-3), \
        float(jnp.max(jnp.abs(c_fin[None] - c_r)))

    print("KERNEL_OK")
</pallas_src>

<mosaic_0001>
module attributes {stable_mosaic.version = 11 : i64} {
  func.func @decoder_lstm_kernel(%arg0: i32, %arg1: memref<1x2xi32, #tpu.memory_space<smem>>, %arg2: memref<24x16xf32, #tpu.memory_space<any>>, %arg3: memref<2x32xf32, #tpu.memory_space<vmem>>, %arg4: memref<2x32xf32, #tpu.memory_space<vmem>>, %arg5: memref<16x33xf32, #tpu.memory_space<vmem>>, %arg6: memref<2x16xf32, #tpu.memory_space<vmem>>, %arg7: memref<16x2xf32, #tpu.memory_space<vmem>>, %arg8: memref<32x32xf32, #tpu.memory_space<vmem>>, %arg9: memref<33x32xf32, #tpu.memory_space<vmem>>, %arg10: memref<1x32xf32, #tpu.memory_space<vmem>>, %arg11: memref<1x32xf32, #tpu.memory_space<vmem>>, %arg12: memref<16x128xf32, #tpu.memory_space<vmem>>, %arg13: memref<32x128xf32, #tpu.memory_space<vmem>>, %arg14: memref<32x128xf32, #tpu.memory_space<vmem>>, %arg15: memref<1x128xf32, #tpu.memory_space<vmem>>, %arg16: memref<32x128xf32, #tpu.memory_space<vmem>>, %arg17: memref<32x128xf32, #tpu.memory_space<vmem>>, %arg18: memref<16x128xf32, #tpu.memory_space<vmem>>, %arg19: memref<1x128xf32, #tpu.memory_space<vmem>>, %arg20: memref<2x128xf32, #tpu.memory_space<vmem>>, %arg21: memref<1x2x128xf32, #tpu.memory_space<vmem>>, %arg22: memref<2x16xf32, #tpu.memory_space<vmem>>, %arg23: memref<2x!tpu.dma_semaphore, #tpu.memory_space<semaphore_mem>>, %arg24: memref<2x32xf32, #tpu.memory_space<vmem>>, %arg25: memref<2x32xf32, #tpu.memory_space<vmem>>) attributes {dimension_semantics = [#tpu.dimension_semantics<arbitrary>], iteration_bounds = array<i64: 1>, scalar_prefetch = 1 : i64, scratch_operands = 4 : i64, tpu.core_type = #tpu.core_type<tc>, window_params = [{}, {pipeline_mode = #tpu.pipeline_mode<synchronous>, transform_indices = @transform_1, window_bounds = array<i64: 2, 32>}, {pipeline_mode = #tpu.pipeline_mode<synchronous>, transform_indices = @transform_2, window_bounds = array<i64: 2, 32>}, {pipeline_mode = #tpu.pipeline_mode<synchronous>, transform_indices = @transform_3, window_bounds = array<i64: 16, 33>}, {pipeline_mode = #tpu.pipeline_mode<synchronous>, transform_indices = @transform_4, window_bounds = array<i64: 2, 16>}, {pipeline_mode = #tpu.pipeline_mode<synchronous>, transform_indices = @transform_5, window_bounds = array<i64: 16, 2>}, {pipeline_mode = #tpu.pipeline_mode<synchronous>, transform_indices = @transform_6, window_bounds = array<i64: 32, 32>}, {pipeline_mode = #tpu.pipeline_mode<synchronous>, transform_indices = @transform_7, window_bounds = array<i64: 33, 32>}, {pipeline_mode = #tpu.pipeline_mode<synchronous>, transform_indices = @transform_8, window_bounds = array<i64: 1, 32>}, {pipeline_mode = #tpu.pipeline_mode<synchronous>, transform_indices = @transform_9, window_bounds = array<i64: 1, 32>}, {pipeline_mode = #tpu.pipeline_mode<synchronous>, transform_indices = @transform_10, window_bounds = array<i64: 16, 128>}, {pipeline_mode = #tpu.pipeline_mode<synchronous>, transform_indices = @transform_11, window_bounds = array<i64: 32, 128>}, {pipeline_mode = #tpu.pipeline_mode<synchronous>, transform_indices = @transform_12, window_bounds = array<i64: 32, 128>}, {pipeline_mode = #tpu.pipeline_mode<synchronous>, transform_indices = @transform_13, window_bounds = array<i64: 1, 128>}, {pipeline_mode = #tpu.pipeline_mode<synchronous>, transform_indices = @transform_14, window_bounds = array<i64: 32, 128>}, {pipeline_mode = #tpu.pipeline_mode<synchronous>, transform_indices = @transform_15, window_bounds = array<i64: 32, 128>}, {pipeline_mode = #tpu.pipeline_mode<synchronous>, transform_indices = @transform_16, window_bounds = array<i64: 16, 128>}, {pipeline_mode = #tpu.pipeline_mode<synchronous>, transform_indices = @transform_17, window_bounds = array<i64: 1, 128>}, {pipeline_mode = #tpu.pipeline_mode<synchronous>, transform_indices = @transform_18, window_bounds = array<i64: 2, 128>}, {transform_indices = @transform_19, window_bounds = array<i64: 1, 2, 128>}]} {
    %c0_i32 = arith.constant 0 : i32
    %0 = arith.cmpi eq, %arg0, %c0_i32 : i32
    %1 = arith.extui %0 : i1 to i32
    %c0_i32_0 = arith.constant 0 : i32
    %2 = arith.cmpi ne, %1, %c0_i32_0 : i32
    scf.if %2 {
      %c0_78 = arith.constant 0 : index
      %c0_79 = arith.constant 0 : index
      %115 = vector.load %arg3[%c0_78, %c0_79] : memref<2x32xf32, #tpu.memory_space<vmem>>, vector<2x32xf32>
      %c0_80 = arith.constant 0 : index
      %c0_81 = arith.constant 0 : index
      %116 = vector.load %arg24[%c0_80, %c0_81] : memref<2x32xf32, #tpu.memory_space<vmem>>, vector<2x32xf32>
      tpu.vector_store %arg24[%c0_80, %c0_81], %115 {strides = array<i32>} : memref<2x32xf32, #tpu.memory_space<vmem>>, vector<2x32xf32>,
      %c0_82 = arith.constant 0 : index
      %c0_83 = arith.constant 0 : index
      %117 = vector.load %arg4[%c0_82, %c0_83] : memref<2x32xf32, #tpu.memory_space<vmem>>, vector<2x32xf32>
      %c0_84 = arith.constant 0 : index
      %c0_85 = arith.constant 0 : index
      %118 = vector.load %arg25[%c0_84, %c0_85] : memref<2x32xf32, #tpu.memory_space<vmem>>, vector<2x32xf32>
      tpu.vector_store %arg25[%c0_84, %c0_85], %117 {strides = array<i32>} : memref<2x32xf32, #tpu.memory_space<vmem>>, vector<2x32xf32>,
    } else {
    }
    %3 = arith.index_cast %arg0 : i32 to index
    %c0 = arith.constant 0 : index
    %4 = memref.load %arg1[%3, %c0] : memref<1x2xi32, #tpu.memory_space<smem>>
    %c0_i32_1 = arith.constant 0 : i32
    %c0_i32_2 = arith.constant 0 : i32
    %5 = tpu.memref_slice %arg2[%4, %c0_i32_2] : memref<24x16xf32, #tpu.memory_space<any>> -> memref<1x16xf32, #tpu.memory_space<any>>
    %c0_i32_3 = arith.constant 0 : i32
    %c0_i32_4 = arith.constant 0 : i32
    %6 = tpu.memref_slice %arg22[%c0_i32_3, %c0_i32_4] : memref<2x16xf32, #tpu.memory_space<vmem>> -> memref<1x16xf32, #tpu.memory_space<vmem>>
    %7 = tpu.memref_slice %arg23[%c0_i32_1] : memref<2x!tpu.dma_semaphore, #tpu.memory_space<semaphore_mem>> -> memref<1x!tpu.dma_semaphore, #tpu.memory_space<semaphore_mem>>
    %8 = tpu.memref_squeeze %7 : memref<1x!tpu.dma_semaphore, #tpu.memory_space<semaphore_mem>> -> memref<!tpu.dma_semaphore, #tpu.memory_space<semaphore_mem>>
    tpu.enqueue_dma source(%5 : memref<1x16xf32, #tpu.memory_space<any>>) target(%6 : memref<1x16xf32, #tpu.memory_space<vmem>>) target_semaphore(%8 : memref<!tpu.dma_semaphore, #tpu.memory_space<semaphore_mem>>)
    %9 = arith.index_cast %arg0 : i32 to index
    %c1 = arith.constant 1 : index
    %10 = memref.load %arg1[%9, %c1] : memref<1x2xi32, #tpu.memory_space<smem>>
    %c1_i32 = arith.constant 1 : i32
    %c0_i32_5 = arith.constant 0 : i32
    %11 = tpu.memref_slice %arg2[%10, %c0_i32_5] : memref<24x16xf32, #tpu.memory_space<any>> -> memref<1x16xf32, #tpu.memory_space<any>>
    %c1_i32_6 = arith.constant 1 : i32
    %c0_i32_7 = arith.constant 0 : i32
    %12 = tpu.memref_slice %arg22[%c1_i32_6, %c0_i32_7] : memref<2x16xf32, #tpu.memory_space<vmem>> -> memref<1x16xf32, #tpu.memory_space<vmem>>
    %13 = tpu.memref_slice %arg23[%c1_i32] : memref<2x!tpu.dma_semaphore, #tpu.memory_space<semaphore_mem>> -> memref<1x!tpu.dma_semaphore, #tpu.memory_space<semaphore_mem>>
    %14 = tpu.memref_squeeze %13 : memref<1x!tpu.dma_semaphore, #tpu.memory_space<semaphore_mem>> -> memref<!tpu.dma_semaphore, #tpu.memory_space<semaphore_mem>>
    tpu.enqueue_dma source(%11 : memref<1x16xf32, #tpu.memory_space<any>>) target(%12 : memref<1x16xf32, #tpu.memory_space<vmem>>) target_semaphore(%14 : memref<!tpu.dma_semaphore, #tpu.memory_space<semaphore_mem>>)
    %c0_i32_8 = arith.constant 0 : i32
    %c0_i32_9 = arith.constant 0 : i32
    %15 = tpu.memref_slice %arg2[%4, %c0_i32_9] : memref<24x16xf32, #tpu.memory_space<any>> -> memref<1x16xf32, #tpu.memory_space<any>>
    %c0_i32_10 = arith.constant 0 : i32
    %c0_i32_11 = arith.constant 0 : i32
    %16 = tpu.memref_slice %arg22[%c0_i32_10, %c0_i32_11] : memref<2x16xf32, #tpu.memory_space<vmem>> -> memref<1x16xf32, #tpu.memory_space<vmem>>
    %17 = tpu.memref_slice %arg23[%c0_i32_8] : memref<2x!tpu.dma_semaphore, #tpu.memory_space<semaphore_mem>> -> memref<1x!tpu.dma_semaphore, #tpu.memory_space<semaphore_mem>>
    %18 = tpu.memref_squeeze %17 : memref<1x!tpu.dma_semaphore, #tpu.memory_space<semaphore_mem>> -> memref<!tpu.dma_semaphore, #tpu.memory_space<semaphore_mem>>
    tpu.wait_dma2 semaphore(%18 : memref<!tpu.dma_semaphore, #tpu.memory_space<semaphore_mem>>) src(%15 : memref<1x16xf32, #tpu.memory_space<any>>) dst(%16 : memref<1x16xf32, #tpu.memory_space<vmem>>)
    %c1_i32_12 = arith.constant 1 : i32
    %c0_i32_13 = arith.constant 0 : i32
    %19 = tpu.memref_slice %arg2[%10, %c0_i32_13] : memref<24x16xf32, #tpu.memory_space<any>> -> memref<1x16xf32, #tpu.memory_space<any>>
    %c1_i32_14 = arith.constant 1 : i32
    %c0_i32_15 = arith.constant 0 : i32
    %20 = tpu.memref_slice %arg22[%c1_i32_14, %c0_i32_15] : memref<2x16xf32, #tpu.memory_space<vmem>> -> memref<1x16xf32, #tpu.memory_space<vmem>>
    %21 = tpu.memref_slice %arg23[%c1_i32_12] : memref<2x!tpu.dma_semaphore, #tpu.memory_space<semaphore_mem>> -> memref<1x!tpu.dma_semaphore, #tpu.memory_space<semaphore_mem>>
    %22 = tpu.memref_squeeze %21 : memref<1x!tpu.dma_semaphore, #tpu.memory_space<semaphore_mem>> -> memref<!tpu.dma_semaphore, #tpu.memory_space<semaphore_mem>>
    tpu.wait_dma2 semaphore(%22 : memref<!tpu.dma_semaphore, #tpu.memory_space<semaphore_mem>>) src(%19 : memref<1x16xf32, #tpu.memory_space<any>>) dst(%20 : memref<1x16xf32, #tpu.memory_space<vmem>>)
    %c0_16 = arith.constant 0 : index
    %c0_17 = arith.constant 0 : index
    %23 = vector.load %arg22[%c0_16, %c0_17] : memref<2x16xf32, #tpu.memory_space<vmem>>, vector<2x16xf32>
    %c0_18 = arith.constant 0 : index
    %c0_19 = arith.constant 0 : index
    %24 = vector.load %arg24[%c0_18, %c0_19] : memref<2x32xf32, #tpu.memory_space<vmem>>, vector<2x32xf32>
    %c0_20 = arith.constant 0 : index
    %c0_21 = arith.constant 0 : index
    %25 = vector.load %arg25[%c0_20, %c0_21] : memref<2x32xf32, #tpu.memory_space<vmem>>, vector<2x32xf32>
    %c0_22 = arith.constant 0 : index
    %c0_23 = arith.constant 0 : index
    %26 = vector.load %arg8[%c0_22, %c0_23] : memref<32x32xf32, #tpu.memory_space<vmem>>, vector<32x32xf32>
    %cst = arith.constant dense<0.000000e+00> : vector<2x32xf32>
    %27 = tpu.matmul %24, %26, %cst {dimension_numbers = #tpu.dot_dimension_numbers<[1], [0], [0], [1], [0, 0, 1, 1], [], []>} : vector<2x32xf32>, vector<32x32xf32>, vector<2x32xf32> -> vector<2x32xf32>
    %c0_24 = arith.constant 0 : index
    %c0_25 = arith.constant 0 : index
    %28 = vector.load %arg10[%c0_24, %c0_25] : memref<1x32xf32, #tpu.memory_space<vmem>>, vector<1x32xf32>
    %29 = vector.broadcast %28 : vector<1x32xf32> to vector<2x32xf32>
    %30 = arith.addf %27, %29 : vector<2x32xf32>
    %c0_26 = arith.constant 0 : index
    %c0_27 = arith.constant 0 : index
    %31 = vector.load %arg7[%c0_26, %c0_27] : memref<16x2xf32, #tpu.memory_space<vmem>>, vector<16x2xf32>
    %cst_28 = arith.constant dense<0.000000e+00> : vector<16x32xf32>
    %32 = tpu.matmul %31, %30, %cst_28 {dimension_numbers = #tpu.dot_dimension_numbers<[1], [0], [0], [1], [0, 0, 1, 1], [], []>} : vector<16x2xf32>, vector<2x32xf32>, vector<16x32xf32> -> vector<16x32xf32>
    %c0_29 = arith.constant 0 : index
    %c0_30 = arith.constant 0 : index
    %33 = vector.load %arg5[%c0_29, %c0_30] : memref<16x33xf32, #tpu.memory_space<vmem>>, vector<16x33xf32>
    %c0_31 = arith.constant 0 : index
    %c0_32 = arith.constant 0 : index
    %34 = vector.load %arg9[%c0_31, %c0_32] : memref<33x32xf32, #tpu.memory_space<vmem>>, vector<33x32xf32>
    %cst_33 = arith.constant dense<0.000000e+00> : vector<16x32xf32>
    %35 = tpu.matmul %33, %34, %cst_33 {dimension_numbers = #tpu.dot_dimension_numbers<[1], [0], [0], [1], [0, 0, 1, 1], [], []>} : vector<16x33xf32>, vector<33x32xf32>, vector<16x32xf32> -> vector<16x32xf32>
    %36 = arith.addf %35, %32 : vector<16x32xf32>
    %37 = math.tanh %36 : vector<16x32xf32>
    %c0_34 = arith.constant 0 : index
    %c0_35 = arith.constant 0 : index
    %38 = vector.load %arg11[%c0_34, %c0_35] : memref<1x32xf32, #tpu.memory_space<vmem>>, vector<1x32xf32>
    %39 = vector.broadcast %38 : vector<1x32xf32> to vector<16x32xf32>
    %40 = arith.mulf %37, %39 : vector<16x32xf32>
    %cst_36 = arith.constant dense<0.000000e+00> : vector<16xf32>
    %41 = vector.multi_reduction <add>, %40, %cst_36 [1] : vector<16x32xf32> to vector<16xf32>
    %42 = vector.shape_cast %41 : vector<16xf32> to vector<16x1xf32>
    %43 = vector.shape_cast %42 : vector<16x1xf32> to vector<1x16x1xf32>
    %cst_37 = arith.constant dense<0xFF800000> : vector<1xf32>
    %44 = vector.multi_reduction <maximumf>, %43, %cst_37 [1, 2] : vector<1x16x1xf32> to vector<1xf32>
    %45 = vector.shape_cast %44 : vector<1xf32> to vector<1x1x1xf32>
    %46 = vector.extract %45[0, 0, 0] : f32 from vector<1x1x1xf32>
    %47 = vector.broadcast %46 : f32 to vector<16x1xf32>
    %48 = arith.subf %42, %47 : vector<16x1xf32>
    %49 = math.exp %48 : vector<16x1xf32>
    %c0_38 = arith.constant 0 : index
    %c0_39 = arith.constant 0 : index
    %50 = vector.load %arg6[%c0_38, %c0_39] : memref<2x16xf32, #tpu.memory_space<vmem>>, vector<2x16xf32>
    %c0_40 = arith.constant 0 : index
    %c0_41 = arith.constant 0 : index
    %51 = vector.load %arg5[%c0_40, %c0_41] : memref<16x33xf32, #tpu.memory_space<vmem>>, vector<16x33xf32>
    %52 = vector.broadcast %49 : vector<16x1xf32> to vector<16x33xf32>
    %53 = arith.mulf %52, %51 : vector<16x33xf32>
    %cst_42 = arith.constant dense<0.000000e+00> : vector<2x33xf32>
    %54 = tpu.matmul %50, %53, %cst_42 {dimension_numbers = #tpu.dot_dimension_numbers<[1], [0], [0], [1], [0, 0, 1, 1], [], []>} : vector<2x16xf32>, vector<16x33xf32>, vector<2x33xf32> -> vector<2x33xf32>
    %55 = vector.extract_strided_slice %54 {offsets = [0, 32], sizes = [2, 1], strides = [1, 1]} : vector<2x33xf32> to vector<2x1xf32>
    %56 = tpu.reciprocal %55 {approx = true} : vector<2x1xf32> -> vector<2x1xf32>
    %57 = vector.extract_strided_slice %54 {offsets = [0, 0], sizes = [2, 32], strides = [1, 1]} : vector<2x33xf32> to vector<2x32xf32>
    %58 = vector.broadcast %56 : vector<2x1xf32> to vector<2x32xf32>
    %59 = arith.mulf %57, %58 : vector<2x32xf32>
    %c0_43 = arith.constant 0 : index
    %c0_44 = arith.constant 0 : index
    %60 = vector.load %arg12[%c0_43, %c0_44] : memref<16x128xf32, #tpu.memory_space<vmem>>, vector<16x128xf32>
    %cst_45 = arith.constant dense<0.000000e+00> : vector<2x128xf32>
    %61 = tpu.matmul %23, %60, %cst_45 {dimension_numbers = #tpu.dot_dimension_numbers<[1], [0], [0], [1], [0, 0, 1, 1], [], []>} : vector<2x16xf32>, vector<16x128xf32>, vector<2x128xf32> -> vector<2x128xf32>
    %c0_46 = arith.constant 0 : index
    %c0_47 = arith.constant 0 : index
    %62 = vector.load %arg13[%c0_46, %c0_47] : memref<32x128xf32, #tpu.memory_space<vmem>>, vector<32x128xf32>
    %cst_48 = arith.constant dense<0.000000e+00> : vector<2x128xf32>
    %63 = tpu.matmul %59, %62, %cst_48 {dimension_numbers = #tpu.dot_dimension_numbers<[1], [0], [0], [1], [0, 0, 1, 1], [], []>} : vector<2x32xf32>, vector<32x128xf32>, vector<2x128xf32> -> vector<2x128xf32>
    %64 = arith.addf %61, %63 : vector<2x128xf32>
    %c0_49 = arith.constant 0 : index
    %c0_50 = arith.constant 0 : index
    %65 = vector.load %arg14[%c0_49, %c0_50] : memref<32x128xf32, #tpu.memory_space<vmem>>, vector<32x128xf32>
    %cst_51 = arith.constant dense<0.000000e+00> : vector<2x128xf32>
    %66 = tpu.matmul %24, %65, %cst_51 {dimension_numbers = #tpu.dot_dimension_numbers<[1], [0], [0], [1], [0, 0, 1, 1], [], []>} : vector<2x32xf32>, vector<32x128xf32>, vector<2x128xf32> -> vector<2x128xf32>
    %67 = arith.addf %64, %66 : vector<2x128xf32>
    %c0_52 = arith.constant 0 : index
    %c0_53 = arith.constant 0 : index
    %68 = vector.load %arg15[%c0_52, %c0_53] : memref<1x128xf32, #tpu.memory_space<vmem>>, vector<1x128xf32>
    %69 = vector.broadcast %68 : vector<1x128xf32> to vector<2x128xf32>
    %70 = arith.addf %67, %69 : vector<2x128xf32>
    %71 = vector.extract_strided_slice %70 {offsets = [0, 0], sizes = [2, 32], strides = [1, 1]} : vector<2x128xf32> to vector<2x32xf32>
    %72 = arith.negf %71 : vector<2x32xf32>
    %73 = math.exp %72 : vector<2x32xf32>
    %cst_54 = arith.constant 1.000000e+00 : f32
    %74 = vector.broadcast %cst_54 : f32 to vector<2x32xf32>
    %75 = arith.addf %74, %73 : vector<2x32xf32>
    %76 = arith.divf %74, %75 : vector<2x32xf32>
    %77 = vector.extract_strided_slice %70 {offsets = [0, 32], sizes = [2, 32], strides = [1, 1]} : vector<2x128xf32> to vector<2x32xf32>
    %78 = arith.negf %77 : vector<2x32xf32>
    %79 = math.exp %78 : vector<2x32xf32>
    %cst_55 = arith.constant 1.000000e+00 : f32
    %80 = vector.broadcast %cst_55 : f32 to vector<2x32xf32>
    %81 = arith.addf %80, %79 : vector<2x32xf32>
    %82 = arith.divf %80, %81 : vector<2x32xf32>
    %83 = vector.extract_strided_slice %70 {offsets = [0, 64], sizes = [2, 32], strides = [1, 1]} : vector<2x128xf32> to vector<2x32xf32>
    %84 = math.tanh %83 : vector<2x32xf32>
    %85 = vector.extract_strided_slice %70 {offsets = [0, 96], sizes = [2, 32], strides = [1, 1]} : vector<2x128xf32> to vector<2x32xf32>
    %86 = arith.negf %85 : vector<2x32xf32>
    %87 = math.exp %86 : vector<2x32xf32>
    %cst_56 = arith.constant 1.000000e+00 : f32
    %88 = vector.broadcast %cst_56 : f32 to vector<2x32xf32>
    %89 = arith.addf %88, %87 : vector<2x32xf32>
    %90 = arith.divf %88, %89 : vector<2x32xf32>
    %91 = arith.mulf %82, %25 : vector<2x32xf32>
    %92 = arith.mulf %76, %84 : vector<2x32xf32>
    %93 = arith.addf %91, %92 : vector<2x32xf32>
    %94 = math.tanh %93 : vector<2x32xf32>
    %95 = arith.mulf %90, %94 : vector<2x32xf32>
    %c0_57 = arith.constant 0 : index
    %c0_58 = arith.constant 0 : index
    %96 = vector.load %arg16[%c0_57, %c0_58] : memref<32x128xf32, #tpu.memory_space<vmem>>, vector<32x128xf32>
    %cst_59 = arith.constant dense<0.000000e+00> : vector<2x128xf32>
    %97 = tpu.matmul %95, %96, %cst_59 {dimension_numbers = #tpu.dot_dimension_numbers<[1], [0], [0], [1], [0, 0, 1, 1], [], []>} : vector<2x32xf32>, vector<32x128xf32>, vector<2x128xf32> -> vector<2x128xf32>
    %c0_60 = arith.constant 0 : index
    %c0_61 = arith.constant 0 : index
    %98 = vector.load %arg17[%c0_60, %c0_61] : memref<32x128xf32, #tpu.memory_space<vmem>>, vector<32x128xf32>
    %cst_62 = arith.constant dense<0.000000e+00> : vector<2x128xf32>
    %99 = tpu.matmul %59, %98, %cst_62 {dimension_numbers = #tpu.dot_dimension_numbers<[1], [0], [0], [1], [0, 0, 1, 1], [], []>} : vector<2x32xf32>, vector<32x128xf32>, vector<2x128xf32> -> vector<2x128xf32>
    %100 = arith.addf %97, %99 : vector<2x128xf32>
    %c0_63 = arith.constant 0 : index
    %c0_64 = arith.constant 0 : index
    %101 = vector.load %arg18[%c0_63, %c0_64] : memref<16x128xf32, #tpu.memory_space<vmem>>, vector<16x128xf32>
    %cst_65 = arith.constant dense<0.000000e+00> : vector<2x128xf32>
    %102 = tpu.matmul %23, %101, %cst_65 {dimension_numbers = #tpu.dot_dimension_numbers<[1], [0], [0], [1], [0, 0, 1, 1], [], []>} : vector<2x16xf32>, vector<16x128xf32>, vector<2x128xf32> -> vector<2x128xf32>
    %103 = arith.addf %100, %102 : vector<2x128xf32>
    %c0_66 = arith.constant 0 : index
    %c0_67 = arith.constant 0 : index
    %104 = vector.load %arg19[%c0_66, %c0_67] : memref<1x128xf32, #tpu.memory_space<vmem>>, vector<1x128xf32>
    %105 = vector.broadcast %104 : vector<1x128xf32> to vector<2x128xf32>
    %106 = arith.addf %103, %105 : vector<2x128xf32>
    %c0_68 = arith.constant 0 : index
    %c0_69 = arith.constant 0 : index
    %107 = vector.load %arg24[%c0_68, %c0_69] : memref<2x32xf32, #tpu.memory_space<vmem>>, vector<2x32xf32>
    tpu.vector_store %arg24[%c0_68, %c0_69], %95 {strides = array<i32>} : memref<2x32xf32, #tpu.memory_space<vmem>>, vector<2x32xf32>,
    %c0_70 = arith.constant 0 : index
    %c0_71 = arith.constant 0 : index
    %108 = vector.load %arg25[%c0_70, %c0_71] : memref<2x32xf32, #tpu.memory_space<vmem>>, vector<2x32xf32>
    tpu.vector_store %arg25[%c0_70, %c0_71], %93 {strides = array<i32>} : memref<2x32xf32, #tpu.memory_space<vmem>>, vector<2x32xf32>,
    %c0_72 = arith.constant 0 : index
    %c0_73 = arith.constant 0 : index
    %c0_74 = arith.constant 0 : index
    %109 = vector.load %arg21[%c0_72, %c0_73, %c0_74] : memref<1x2x128xf32, #tpu.memory_space<vmem>>, vector<1x2x128xf32>
    %110 = vector.shape_cast %109 : vector<1x2x128xf32> to vector<2x128xf32>
    %111 = vector.shape_cast %106 : vector<2x128xf32> to vector<1x2x128xf32>
    tpu.vector_store %arg21[%c0_72, %c0_73, %c0_74], %111 {strides = array<i32>} : memref<1x2x128xf32, #tpu.memory_space<vmem>>, vector<1x2x128xf32>,
    %cst_75 = arith.constant 0.000000e+00 : f32
    %112 = vector.broadcast %cst_75 : f32 to vector<2x64xf32>
    %113 = tpu.concatenate %95, %93, %112 in 1 : vector<2x32xf32>, vector<2x32xf32>, vector<2x64xf32> -> vector<2x128xf32>
    %c0_76 = arith.constant 0 : index
    %c0_77 = arith.constant 0 : index
    %114 = vector.load %arg20[%c0_76, %c0_77] : memref<2x128xf32, #tpu.memory_space<vmem>>, vector<2x128xf32>
    tpu.vector_store %arg20[%c0_76, %c0_77], %113 {strides = array<i32>} : memref<2x128xf32, #tpu.memory_space<vmem>>, vector<2x128xf32>,
    return
  }
  func.func @transform_1(%arg0: i32, %arg1: memref<1x2xi32, #tpu.memory_space<smem>>) -> (i32, i32) {
    %c0_i32 = arith.constant 0 : i32
    %c0_i32_0 = arith.constant 0 : i32
    %c0_i32_1 = arith.constant 0 : i32
    return %c0_i32, %c0_i32_0 : i32, i32
  }
  func.func @transform_2(%arg0: i32, %arg1: memref<1x2xi32, #tpu.memory_space<smem>>) -> (i32, i32) {
    %c0_i32 = arith.constant 0 : i32
    %c0_i32_0 = arith.constant 0 : i32
    %c0_i32_1 = arith.constant 0 : i32
    return %c0_i32, %c0_i32_0 : i32, i32
  }
  func.func @transform_3(%arg0: i32, %arg1: memref<1x2xi32, #tpu.memory_space<smem>>) -> (i32, i32) {
    %c0_i32 = arith.constant 0 : i32
    %c0_i32_0 = arith.constant 0 : i32
    %c0_i32_1 = arith.constant 0 : i32
    return %c0_i32, %c0_i32_0 : i32, i32
  }
  func.func @transform_4(%arg0: i32, %arg1: memref<1x2xi32, #tpu.memory_space<smem>>) -> (i32, i32) {
    %c0_i32 = arith.constant 0 : i32
    %c0_i32_0 = arith.constant 0 : i32
    %c0_i32_1 = arith.constant 0 : i32
    return %c0_i32, %c0_i32_0 : i32, i32
  }
  func.func @transform_5(%arg0: i32, %arg1: memref<1x2xi32, #tpu.memory_space<smem>>) -> (i32, i32) {
    %c0_i32 = arith.constant 0 : i32
    %c0_i32_0 = arith.constant 0 : i32
    %c0_i32_1 = arith.constant 0 : i32
    return %c0_i32, %c0_i32_0 : i32, i32
  }
  func.func @transform_6(%arg0: i32, %arg1: memref<1x2xi32, #tpu.memory_space<smem>>) -> (i32, i32) {
    %c0_i32 = arith.constant 0 : i32
    %c0_i32_0 = arith.constant 0 : i32
    %c0_i32_1 = arith.constant 0 : i32
    return %c0_i32, %c0_i32_0 : i32, i32
  }
  func.func @transform_7(%arg0: i32, %arg1: memref<1x2xi32, #tpu.memory_space<smem>>) -> (i32, i32) {
    %c0_i32 = arith.constant 0 : i32
    %c0_i32_0 = arith.constant 0 : i32
    %c0_i32_1 = arith.constant 0 : i32
    return %c0_i32, %c0_i32_0 : i32, i32
  }
  func.func @transform_8(%arg0: i32, %arg1: memref<1x2xi32, #tpu.memory_space<smem>>) -> (i32, i32) {
    %c0_i32 = arith.constant 0 : i32
    %c0_i32_0 = arith.constant 0 : i32
    %c0_i32_1 = arith.constant 0 : i32
    return %c0_i32, %c0_i32_0 : i32, i32
  }
  func.func @transform_9(%arg0: i32, %arg1: memref<1x2xi32, #tpu.memory_space<smem>>) -> (i32, i32) {
    %c0_i32 = arith.constant 0 : i32
    %c0_i32_0 = arith.constant 0 : i32
    %c0_i32_1 = arith.constant 0 : i32
    return %c0_i32, %c0_i32_0 : i32, i32
  }
  func.func @transform_10(%arg0: i32, %arg1: memref<1x2xi32, #tpu.memory_space<smem>>) -> (i32, i32) {
    %c0_i32 = arith.constant 0 : i32
    %c0_i32_0 = arith.constant 0 : i32
    %c0_i32_1 = arith.constant 0 : i32
    return %c0_i32, %c0_i32_0 : i32, i32
  }
  func.func @transform_11(%arg0: i32, %arg1: memref<1x2xi32, #tpu.memory_space<smem>>) -> (i32, i32) {
    %c0_i32 = arith.constant 0 : i32
    %c0_i32_0 = arith.constant 0 : i32
    %c0_i32_1 = arith.constant 0 : i32
    return %c0_i32, %c0_i32_0 : i32, i32
  }
  func.func @transform_12(%arg0: i32, %arg1: memref<1x2xi32, #tpu.memory_space<smem>>) -> (i32, i32) {
    %c0_i32 = arith.constant 0 : i32
    %c0_i32_0 = arith.constant 0 : i32
    %c0_i32_1 = arith.constant 0 : i32
    return %c0_i32, %c0_i32_0 : i32, i32
  }
  func.func @transform_13(%arg0: i32, %arg1: memref<1x2xi32, #tpu.memory_space<smem>>) -> (i32, i32) {
    %c0_i32 = arith.constant 0 : i32
    %c0_i32_0 = arith.constant 0 : i32
    %c0_i32_1 = arith.constant 0 : i32
    return %c0_i32, %c0_i32_0 : i32, i32
  }
  func.func @transform_14(%arg0: i32, %arg1: memref<1x2xi32, #tpu.memory_space<smem>>) -> (i32, i32) {
    %c0_i32 = arith.constant 0 : i32
    %c0_i32_0 = arith.constant 0 : i32
    %c0_i32_1 = arith.constant 0 : i32
    return %c0_i32, %c0_i32_0 : i32, i32
  }
  func.func @transform_15(%arg0: i32, %arg1: memref<1x2xi32, #tpu.memory_space<smem>>) -> (i32, i32) {
    %c0_i32 = arith.constant 0 : i32
    %c0_i32_0 = arith.constant 0 : i32
    %c0_i32_1 = arith.constant 0 : i32
    return %c0_i32, %c0_i32_0 : i32, i32
  }
  func.func @transform_16(%arg0: i32, %arg1: memref<1x2xi32, #tpu.memory_space<smem>>) -> (i32, i32) {
    %c0_i32 = arith.constant 0 : i32
    %c0_i32_0 = arith.constant 0 : i32
    %c0_i32_1 = arith.constant 0 : i32
    return %c0_i32, %c0_i32_0 : i32, i32
  }
  func.func @transform_17(%arg0: i32, %arg1: memref<1x2xi32, #tpu.memory_space<smem>>) -> (i32, i32) {
    %c0_i32 = arith.constant 0 : i32
    %c0_i32_0 = arith.constant 0 : i32
    %c0_i32_1 = arith.constant 0 : i32
    return %c0_i32, %c0_i32_0 : i32, i32
  }
  func.func @transform_18(%arg0: i32, %arg1: memref<1x2xi32, #tpu.memory_space<smem>>) -> (i32, i32) {
    %c0_i32 = arith.constant 0 : i32
    %c0_i32_0 = arith.constant 0 : i32
    %c0_i32_1 = arith.constant 0 : i32
    return %c0_i32, %c0_i32_0 : i32, i32
  }
  func.func @transform_19(%arg0: i32, %arg1: memref<1x2xi32, #tpu.memory_space<smem>>) -> (i32, i32, i32) {
    %c0_i32 = arith.constant 0 : i32
    %c0_i32_0 = arith.constant 0 : i32
    %c0_i32_1 = arith.constant 0 : i32
    return %arg0, %c0_i32, %c0_i32_0 : i32, i32, i32
  }
}

</mosaic_0001>

<bundles_post_ra>
// kernel: tpu_custom_call.1
= control target key start
LH: loop header
LB: loop body
LE: loop exit
PB: predicated region body
PF: predicated region fallthrough
CT: control target
= control target key end

     0   :  { %s1992_s0 = inlined_call_operand.hbm [shape: s32[1,2], index: 0, kind: input, shape index: {}]   ;;  %s1993_s1 = inlined_call_operand.vmem [shape: f32[24,16], index: 1, kind: input, shape index: {}]   ;;  %s1994_s2 = inlined_call_operand.hbm [shape: f32[2,32], index: 2, kind: input, shape index: {}]   ;;  %s1995_s3 = inlined_call_operand.hbm [shape: f32[2,32], index: 3, kind: input, shape index: {}]   ;;  %s1996_s4 = inlined_call_operand.hbm [shape: f32[16,33], index: 4, kind: input, shape index: {}]   ;;  %s1997_s5 = inlined_call_operand.hbm [shape: f32[2,16], index: 5, kind: input, shape index: {}]   ;;  %s1998_s6 = inlined_call_operand.vmem [shape: f32[16,2], index: 6, kind: input, shape index: {}]   ;;  %s1999_s7 = inlined_call_operand.vmem [shape: f32[32,32], index: 7, kind: input, shape index: {}]   ;;  %s2000_s8 = inlined_call_operand.vmem [shape: f32[33,32], index: 8, kind: input, shape index: {}]   ;;  %s2001_s9 = inlined_call_operand.vmem [shape: f32[1,32], index: 9, kind: input, shape index: {}]   ;;  %s2002_s10 = inlined_call_operand.hbm [shape: f32[1,32], index: 10, kind: input, shape index: {}]   ;;  %s2003_s11 = inlined_call_operand.vmem [shape: f32[16,128], index: 11, kind: input, shape index: {}]   ;;  %s2004_s12 = inlined_call_operand.vmem [shape: f32[32,128], index: 12, kind: input, shape index: {}]   ;;  %s2005_s13 = inlined_call_operand.vmem [shape: f32[32,128], index: 13, kind: input, shape index: {}]   ;;  %s2006_s14 = inlined_call_operand.hbm [shape: f32[1,128], index: 14, kind: input, shape index: {}]   ;;  %s2007_s15 = inlined_call_operand.hbm [shape: f32[32,128], index: 15, kind: input, shape index: {}]   ;;  %s2008_s16 = inlined_call_operand.hbm [shape: f32[32,128], index: 16, kind: input, shape index: {}]   ;;  %s2009_s17 = inlined_call_operand.vmem [shape: f32[16,128], index: 17, kind: input, shape index: {}]   ;;  %s2010_s18 = inlined_call_operand.vmem [shape: f32[1,128], index: 18, kind: input, shape index: {}]   ;;  %s2011_s19 = inlined_call_operand.hbm [shape: f32[2,128], index: 19, kind: output, shape index: {0}]   ;;  %s2012_s20 = inlined_call_operand.hbm [shape: f32[1,2,128], index: 20, kind: output, shape index: {1}]  }
   0x1   :  { %2015 = sst [smem:[#allocation37_spill]] %s1992_s0 }
   0x2   :  { %2016 = sst [smem:[#allocation38_spill]] %s1993_s1  ;;  %s1672_s1 = smov [#allocation7]  }
   0x3   :  { %2017 = sst [smem:[#allocation39_spill]] %s1994_s2 }
   0x4   :  { %2018 = sst [smem:[#allocation40_spill]] %s1995_s3 }
   0x5   :  { %2019 = sst [smem:[#allocation41_spill]] %s1996_s4 }
   0x6   :  { %2020 = sst [smem:[#allocation42_spill]] %s2005_s13 }
   0x7   :  { %s2021_s13 = sld [smem:[#allocation37_spill]] }
   0xd   :  { %27 = dma.hbm_to_smem %s2021_s13, 16, %s1672_s1, [#allocation6] }
   0xe   :  { %1652 = dma.done.wait [#allocation6], 16 }
   0xf   :  { %1653 = vsyncadd [#allocation6], 4294967280 }
  0x10   :  { %29 = sfence }
  0x11   :  { %30 = vsyncpa [#allocation9], 0 }
  0x12   :  { %31 = vsyncpa [#allocation12], 0 }
  0x13   :  { %32 = vsyncpa [#allocation15], 0 }
  0x14   :  { %33 = vsyncpa [#allocation18], 0 }
  0x15   :  { %34 = vsyncpa [#allocation21], 0 }
  0x16   :  { %35 = vsyncpa [#allocation10], 0 }
  0x17   :  { %36 = vsyncpa [#allocation24], 0  ;;  %s1673_s24 = smov [#allocation11]   ;;  %s1674_s25 = smov [#allocation14]  }
  0x18   :  { %s53_s2 = sshll.u32 %s1673_s24, 4  ;;  %s75_s3 = sshll.u32 %s1674_s25, 4  ;;  %s54_s2 = int_to_ptr.vmem [resolvable:$true] %s53_s2  ;;  %s76_s3 = int_to_ptr.vmem [resolvable:$true] %s75_s3 }
  0x19   :  { %s1460_s26 = scalar_lea.vmem %s54_s2, 32  ;;  %p1465_p1 = scmp.lt.s32.totalorder %s54_s2, %s54_s2 }
  0x1a   :  { %p1461_p0 = scmp.ne.s32.totalorder %s54_s2, %s1460_s26  ;;  %p1466_p2 = scmp.lt.s32.totalorder %s1460_s26, %s1460_s26 }
  0x1c   :  { %p1467_p3 = por %p1466_p2, %p1465_p1 }
  0x1e   :  { %p1468_p4 = pnand %p1467_p3, %p1461_p0 }
  0x20   :  { %1471 = shalt.err (!%p1468_p4)
}
  0x21   :  { %s2022_s28 = sld [smem:[#allocation40_spill]]  ;;  %s1480_s4 = scalar_lea.vmem %s76_s3, 32 }
  0x22   :  { %p1481_p5 = scmp.ne.s32.totalorder %s76_s3, %s1480_s4  ;;  %p1485_p6 = scmp.lt.s32.totalorder %s76_s3, %s76_s3 }
  0x23   :  { %p1486_p7 = scmp.lt.s32.totalorder %s1480_s4, %s1480_s4 }
  0x25   :  { %p1487_p8 = por %p1486_p7, %p1485_p6 }
  0x27   :  { %56 = dma.hbm_to_vmem [thread:$0]  %s2022_s28, 32, %s54_s2, [#allocation12]  }
  0x28   :  { %p1488_p9 = pnand %p1487_p8, %p1481_p5 }
  0x2a   :  { %1491 = shalt.err (!%p1488_p9)
}
  0x2b   :  { %78 = dma.hbm_to_vmem [thread:$0]  %s1997_s5, 32, %s76_s3, [#allocation15]  }
  0x2c   :  { %s1675_s0 = smov [#allocation17]   ;;  %s1676_s1 = smov [#allocation8]  }
  0x2d   :  { %s109_s21 = sshll.u32 %s1675_s0, 4  ;;  %s43_s22 = sshll.u32 %s1676_s1, 4  ;;  %s110_s21 = int_to_ptr.vmem [resolvable:$true] %s109_s21  ;;  %s44_s22 = int_to_ptr.vmem [resolvable:$true] %s43_s22 }
  0x2e   :  { %s1500_s23 = scalar_lea.vmem %s110_s21, 16  ;;  %s1504_s24 = scalar_lea.vmem %s110_s21, 32 }
  0x2f   :  { %p1501_p10 = scmp.ne.s32.totalorder %s110_s21, %s1500_s23  ;;  %p1505_p11 = scmp.lt.s32.totalorder %s110_s21, %s110_s21 }
  0x30   :  { %p1506_p12 = scmp.lt.s32.totalorder %s1504_s24, %s1500_s23 }
  0x32   :  { %p1507_p13 = por %p1506_p12, %p1505_p11 }
  0x34   :  { %p1508_p0 = pnand %p1507_p13, %p1501_p10 }
  0x36   :  { %1511 = shalt.err (!%p1508_p0)
}
  0x37   :  { %112 = dma.hbm_to_vmem [thread:$0]  %s2006_s14, 16, %s110_s21, [#allocation18]  }
  0x38   :  { %s1520_s26 = scalar_lea.vmem %s44_s22, 32  ;;  %p1525_p2 = scmp.lt.s32.totalorder %s44_s22, %s44_s22 }
  0x39   :  { %p1521_p1 = scmp.ne.s32.totalorder %s44_s22, %s1520_s26  ;;  %p1526_p3 = scmp.lt.s32.totalorder %s1520_s26, %s1520_s26 }
  0x3b   :  { %p1527_p4 = por %p1526_p3, %p1525_p2 }
  0x3d   :  { %p1528_p5 = pnand %p1527_p4, %p1521_p1 }
  0x3f   :  { %1531 = shalt.err (!%p1528_p5)
}
  0x40   :  { %s2023_s13 = sld [smem:[#allocation39_spill]]  ;;  %s1677_s27 = smov [#allocation13]  }
  0x41   :  { %s62_s28 = sshll.u32 %s1677_s27, 4  ;;  %s63_s28 = int_to_ptr.vmem [resolvable:$true] %s62_s28 }
  0x42   :  { %s1540_s4 = scalar_lea.vmem %s63_s28, 256  ;;  %p1545_p7 = scmp.lt.s32.totalorder %s63_s28, %s63_s28 }
  0x43   :  { %p1541_p6 = scmp.ne.s32.totalorder %s63_s28, %s1540_s4  ;;  %p1546_p8 = scmp.lt.s32.totalorder %s1540_s4, %s1540_s4 }
  0x45   :  { %p1547_p9 = por %p1546_p8, %p1545_p7 }
  0x46   :  { %46 = dma.hbm_to_vmem [thread:$0]  %s2023_s13, 32, %s44_s22, [#allocation9]  }
  0x47   :  { %p1548_p10 = pnand %p1547_p9, %p1541_p6 }
  0x49   :  { %1551 = shalt.err (!%p1548_p10)
}
  0x4a   :  { %s1678_s14 = smov 128   ;;  %s1679_s29 = smov 8  }
  0x4b   :  { %s2024_s21 = sld [smem:[#allocation41_spill]]  ;;  %s1680_s1 = smov [#allocation16]  }
  0x4c   :  { %s93_s22 = sshll.u32 %s1680_s1, 4  ;;  %s1681_s23 = smov [#allocation19]   ;;  %s94_s22 = int_to_ptr.vmem [resolvable:$true] %s93_s22 }
  0x4d   :  { %s118_s24 = sshll.u32 %s1681_s23, 4  ;;  %s1560_s2 = scalar_lea.vmem %s94_s22, 16  ;;  %s119_s24 = int_to_ptr.vmem [resolvable:$true] %s118_s24 }
  0x4e   :  { %p1561_p11 = scmp.ne.s32.totalorder %s94_s22, %s1560_s2  ;;  %s1564_s25 = scalar_lea.vmem %s94_s22, 32 }
  0x4f   :  { %p1565_p12 = scmp.lt.s32.totalorder %s94_s22, %s94_s22  ;;  %p1566_p13 = scmp.lt.s32.totalorder %s1564_s25, %s1560_s2 }
  0x51   :  { %68 = dma.hbm_to_vmem [thread:$0]  %s2024_s21, 256, %s63_s28, [#allocation12], %s1678_s14, %s1678_s14, %s1679_s29  }
  0x52   :  { %p1567_p0 = por %p1566_p13, %p1565_p12 }
  0x54   :  { %p1568_p1 = pnand %p1567_p0, %p1561_p11 }
  0x56   :  { %1571 = shalt.err (!%p1568_p1)
}
  0x57   :  { %96 = dma.hbm_to_vmem [thread:$0]  %s2002_s10, 16, %s94_s22, [#allocation15]  }
  0x58   :  { %s1580_s3 = scalar_lea.vmem %s119_s24, 512  ;;  %p1585_p3 = scmp.lt.s32.totalorder %s119_s24, %s119_s24 }
  0x59   :  { %p1581_p2 = scmp.ne.s32.totalorder %s119_s24, %s1580_s3  ;;  %p1586_p4 = scmp.lt.s32.totalorder %s1580_s3, %s1580_s3 }
  0x5b   :  { %p1587_p5 = por %p1586_p4, %p1585_p3 }
  0x5d   :  { %p1588_p6 = pnand %p1587_p5, %p1581_p2 }
  0x5f   :  { %1591 = shalt.err (!%p1588_p6)
}
  0x60   :  { %124 = dma.hbm_to_vmem [thread:$0]  %s2007_s15, 512, %s119_s24, [#allocation18], %s1678_s14, %s1678_s14, %s1679_s29  }
  0x61   :  { %s1682_s28 = smov [#allocation20]  }
  0x62   :  { %s130_s4 = sshll.u32 %s1682_s28, 4  ;;  %s131_s4 = int_to_ptr.vmem [resolvable:$true] %s130_s4 }
  0x63   :  { %s1600_s30 = scalar_lea.vmem %s131_s4, 512  ;;  %p1605_p8 = scmp.lt.s32.totalorder %s131_s4, %s131_s4 }
  0x64   :  { %p1601_p7 = scmp.ne.s32.totalorder %s131_s4, %s1600_s30  ;;  %p1606_p9 = scmp.lt.s32.totalorder %s1600_s30, %s1600_s30 }
  0x66   :  { %p1607_p10 = por %p1606_p9, %p1605_p8 }
  0x68   :  { %p1608_p11 = pnand %p1607_p10, %p1601_p7 }
  0x6a   :  { %1611 = shalt.err (!%p1608_p11)
}
  0x6b   :  { %136 = dma.hbm_to_vmem [thread:$0]  %s2008_s16, 512, %s131_s4, [#allocation21], %s1678_s14, %s1678_s14, %s1679_s29  }
  0x6c   :  { %1654 = dma.done.wait [#allocation9], 32  }
  0x6d   :  { %1655 = vsyncadd [#allocation9], 4294967264 }
  0x6e   :  { %1656 = dma.done.wait [#allocation12], 288  }
  0x6f   :  { %1657 = vsyncadd [#allocation12], 4294967008 }
  0x70   :  { %1658 = dma.done.wait [#allocation15], 48  }
  0x71   :  { %1659 = vsyncadd [#allocation15], 4294967248 }
  0x72   :  { %1660 = dma.done.wait [#allocation18], 528  }
  0x73   :  { %1661 = vsyncadd [#allocation18], 4294966768 }
  0x74   :  { %1662 = dma.done.wait [#allocation21], 512  }
  0x75   :  { %1663 = vsyncadd [#allocation21], 4294966784  ;;  %s175_s15 = sld [smem:[#allocation7]]  ;;  %vm170_vm0 = vcmask 254976   ;;  %v169_v0 = vld [vmem:[#allocation8] sm:$0x3] }
  0x76   :  { %v172_v1 = vld [vmem:[#allocation11] sm:$0x3]  ;;  %s2025_s22 = sld [smem:[#allocation38_spill]]  ;;  %171 = vst.msk [vmem:[#allocation4] sm:$0x3] %vm170_vm0, %v169_v0 }
  0x77   :  { %173 = vst.msk [vmem:[#allocation5] sm:$0x3] %vm170_vm0, %v172_v1 }
  0x7c   :  { %s176_s23 = scalar_lea.vmem %s2025_s22, %s175_s15 }
  0x7d   :  { %v195_v2 = vld [vmem:[%s176_s23] sm:$0x1] }
  0x7e   :  { %196 = vst [vmem:[#allocation2] sm:$0x1] %v195_v2 }
  0x7f   :  { %222 = vsyncadd [#allocation3], 16  ;;  %s1243_s16 = sld [smem:[#allocation7 + $0x1]] }
  0x85   :  { %s225_s24 = scalar_lea.vmem %s2025_s22, %s1243_s16 }
  0x86   :  { %v246_v3 = vld [vmem:[%s225_s24] sm:$0x1] }
  0x87   :  { %247 = vst [vmem:[#allocation2 + $0x1] sm:$0x1] %v246_v3 }
  0x88   :  { %273 = vsyncadd [#allocation3 + $0x1], 16 }
  0x89   :  { %1664 = dma.done.wait [#allocation3], 16 }
  0x8a   :  { %1665 = vsyncadd [#allocation3], 4294967280 }
  0x8b   :  { %1666 = dma.done.wait [#allocation3 + $0x1], 16 }
  0x8c   :  { %1667 = vsyncadd [#allocation3 + $0x1], 4294967280  ;;  %v1683_v4 = vmov 0.0   ;;  %vm1684_vm1 = vmmov 0   ;;  %v285_v5 = vld [vmem:[%s1999_s7 + $0x18] sm:$0xff]  ;;  %v284_v6 = vld [vmem:[%s1999_s7 + $0x10] sm:$0xff] }
  0x8d   :  { %1309 = vmatprep.subr.mxu0 %v1683_v4  ;;  %1317 = vmatprep.mubr.msk.f32.mxu0 %vm1684_vm1, %v1683_v4  ;;  %v283_v7 = vld [vmem:[%s1999_s7 + $0x8] sm:$0xff]  ;;  %v282_v8 = vld [vmem:[%s1999_s7] sm:$0xff]  ;;  %vm293_vm2 = vcmask 261120   ;;  %vm369_vm3 = vcmask 15360   ;;  %vm376_vm4 = vcmask 1041408   ;;  %vm469_vm5 = vcmask 1040384  }
  0x8e   :  { %1310 = vmatpush3.msra.mxu0 %v285_v5  ;;  %v1857_v9 = vld [vmem:[#allocation4] sm:$0x3]  ;;  %v1244_v11 = vld [vmem:[%s2001_s9] ss:$0 sm:$0xff]  ;;  %v368_v15 = vld [vmem:[%s1998_s6 + $0x8] sm:$0xff]  ;;  %vm462_vm6 = vcmask 269312  }
  0x8f   :  { %1311 = vmatprep.subr.mxu0 %v1683_v4  ;;  %v367_v10 = vld [vmem:[%s1998_s6] sm:$0xff]  ;;  %v455_v17 = vld [vmem:[#allocation13] sm:$0xff]  ;;  %v460_v18 = vld [vmem:[%s2000_s8 + $0x18] sm:$0xff]  ;;  %vm583_vm7 = vcmask 130048   ;;  %v1685_v55 = vmov 32   ;;  %s2026_s7 = sld [smem:[#allocation42_spill]] }
  0x90   :  { %1312 = vmatpush3.msra.mxu0 %v284_v6  ;;  %1322 = vmatprep.mubr.msk.f32.mxu1 %vm369_vm3, %v367_v10  ;;  %v461_v16 = vld [vmem:[%s2000_s8 + $0x20] sm:$0x1]  ;;  %v459_v19 = vld [vmem:[%s2000_s8 + $0x10] sm:$0xff]  ;;  %v458_v20 = vld [vmem:[%s2000_s8 + $0x8] sm:$0xff]  ;;  %s1687_s6 = smov 64   ;;  %s1688_s2 = smov 96  }
  0x91   :  { %1313 = vmatprep.subr.mxu0 %v1683_v4  ;;  %v457_v21 = vld [vmem:[%s2000_s8] sm:$0xff]  ;;  %v456_v22 = vld [vmem:[#allocation13 + $0x8] sm:$0xff]  ;;  %v1252_v31 = vld [vmem:[#allocation16] ss:$0 sm:$0xff]  ;;  %1424 = vset.pattern.permute.xlu1 %v1685_v55  ;;  %vm1171_vm8 = vcmask 523264  }
  0x92   :  { %1314 = vmatpush3.msra.mxu0 %v283_v7  ;;  %v580_v54 = vld [vmem:[#allocation14] sm:$0x3]  ;;  %1425 = vset.pattern.permute.xlu0 %v1685_v55  ;;  %v665_v56 = vld [vmem:[%s2003_s11 + $0x8] sm:$0xff]  ;;  %v664_v58 = vld [vmem:[%s2003_s11] sm:$0xff] }
  0x93   :  { %1315 = vmatprep.subr.mxu0 %v1683_v4  ;;  %v669_v57 = vld [vmem:[%s2004_s12 + $0x18] sm:$0xff]  ;;  %v668_v59 = vld [vmem:[%s2004_s12 + $0x10] sm:$0xff]  ;;  %v1913_v60 = vld [vmem:[#allocation2] sm:$0x3] }
  0x94   :  { %1316 = vmatpush3.msra.mxu0 %v282_v8  ;;  %v667_v62 = vld [vmem:[%s2004_s12 + $0x8] sm:$0xff]  ;;  %v666_v3 = vld [vmem:[%s2004_s12] sm:$0xff]  ;;  %s1686_s12 = smov 32  }
  0x95   :  { %1318 = vmatmul.mubr.msk.f32.vlgmr.msra.gmra.mxu0 %vm293_vm2, %v1857_v9  ;;  %1338 = vmatprep.subr.mxu0 %v1683_v4  ;;  %v819_v61 = vld [vmem:[%s2026_s7 + $0x18] sm:$0xff]  ;;  %v818_v63 = vld [vmem:[%s2026_s7 + $0x10] sm:$0xff]  ;;  %v817_v2 = vld [vmem:[%s2026_s7 + $0x8] sm:$0xff] }
  0x96   :  { %1342 = vmatprep.mubr.msk.f32.mxu0 %vm1684_vm1, %v1683_v4  ;;  %v816_v5 = vld [vmem:[%s2026_s7] sm:$0xff] }
  0x97   :  { %v281_v7 = vld [vmem:[#allocation5] sm:$0x3] }
 0x155   :  { %v363_v12 = vpop.f32.mrf.mxu0 }
 0x156   :  { %v364_v13 = vadd.f32 %v1244_v11, %v363_v12 }
 0x157   :  { %v1319_v14 = vpop.f32.mrf.mxu0 }
 0x158   :  { %1320 = vmatprep.subr.msk.mxu1 %vm376_vm4, %v364_v13  ;;  %v933_v14 = vld [vmem:[#allocation20 + $0x10] sm:$0xff] }
 0x159   :  { %1321 = vmatpush3.msk.msra.mxu1 %vm376_vm4, %v364_v13  ;;  %v934_v13 = vld [vmem:[#allocation20 + $0x18] sm:$0xff] }
 0x15a   :  { %1323 = vmatmul.mubr.msk.f32.vlgmr.msra.gmra.mxu1 %vm369_vm3, %v368_v15  ;;  %1325 = vmatprep.subr.msk.mxu1 %vm469_vm5, %v461_v16  ;;  %v931_v15 = vld [vmem:[#allocation20] sm:$0xff] }
 0x15b   :  { %1326 = vmatpush3.msk.msra.mxu1 %vm469_vm5, %v461_v16  ;;  %1335 = vmatprep.mubr.msk.f32.mxu1 %vm462_vm6, %v455_v17 }
 0x15c   :  { %1327 = vmatprep.subr.mxu1 %v460_v18 }
 0x15d   :  { %1328 = vmatpush3.msra.mxu1 %v460_v18 }
 0x15e   :  { %1329 = vmatprep.subr.mxu1 %v459_v19 }
 0x15f   :  { %1330 = vmatpush3.msra.mxu1 %v459_v19 }
 0x160   :  { %1331 = vmatprep.subr.mxu1 %v458_v20 }
 0x161   :  { %1332 = vmatpush3.msra.mxu1 %v458_v20  ;;  %v1257_v20 = vld [vmem:[#allocation17] ss:$0 sm:$0xff] }
 0x162   :  { %1333 = vmatprep.subr.mxu1 %v457_v21 }
 0x163   :  { %1334 = vmatpush3.msra.mxu1 %v457_v21 }
 0x164   :  { %1336 = vmatmul.mubr.msk.f32.vlgmr.msra.gmra.mxu1 %vm462_vm6, %v456_v22  ;;  %1356 = vmatprep.subr.mxu1 %v1683_v4 }
 0x165   :  { %1360 = vmatprep.mubr.msk.f32.mxu1 %vm1684_vm1, %v1683_v4  ;;  %1357 = vmatpush3.msra.mxu1 %v665_v56 }
 0x166   :  { %1358 = vmatprep.subr.mxu1 %v1683_v4 }
 0x167   :  { %1359 = vmatpush3.msra.mxu1 %v664_v58 }
 0x168   :  { %1363 = vmatprep.subr.mxu1 %v1683_v4  ;;  %1361 = vmatmul.mubr.msk.f32.vlgmr.msra.gmra.mxu1 %vm583_vm7, %v1913_v60 }
 0x169   :  { %1364 = vmatpush3.msra.mxu1 %v819_v61  ;;  %1371 = vmatprep.mubr.msk.f32.mxu1 %vm1684_vm1, %v1683_v4 }
 0x16a   :  { %1365 = vmatprep.subr.mxu1 %v1683_v4 }
 0x16b   :  { %1366 = vmatpush3.msra.mxu1 %v818_v63 }
 0x16c   :  { %1367 = vmatprep.subr.mxu1 %v1683_v4 }
 0x16d   :  { %1368 = vmatpush3.msra.mxu1 %v817_v2 }
 0x16e   :  { %1369 = vmatprep.subr.mxu1 %v1683_v4 }
 0x16f   :  { %1370 = vmatpush3.msra.mxu1 %v816_v5 }
 0x170   :  { %1372 = vmatmul.mubr.msk.f32.vlgmr.msra.gmra.mxu1 %vm293_vm2, %v1857_v9  ;;  %1385 = vmatprep.subr.mxu1 %v1683_v4  ;;  %v932_v9 = vld [vmem:[#allocation20 + $0x8] sm:$0xff] }
 0x171   :  { %1393 = vmatprep.mubr.msk.f32.mxu1 %vm1684_vm1, %v1683_v4 }
 0x21a   :  { %v1324_v23 = vpop.f32.mrf.mxu1 }
 0x21c   :  { %v446_v24 = vpop.f32.mrf.mxu1 }
 0x224   :  { %v1337_v25 = vpop.f32.mrf.mxu1 }
 0x225   :  { %v545_v26 = vadd.f32 %v1337_v25, %v1324_v23 }
 0x226   :  { %v539_v27 = vpop.f32.mrf.mxu1 }
 0x227   :  { %v540_v28 = vadd.f32 %v539_v27, %v446_v24  ;;  %1426 = vtanh.f32 %v545_v26 }
 0x228   :  { %v812_v8 = vpop.f32.mrf.mxu1 }
 0x229   :  { %1428 = vtanh.f32 %v540_v28 }
 0x22a   :  { %v1362_v10 = vpop.f32.mrf.mxu1 }
 0x230   :  { %v886_v16 = vpop.f32.mrf.mxu1 }
 0x234   :  { %v1427_v29 = vpop.eup %1426 }
 0x235   :  { %v558_v34 = vmul.f32 %v1427_v29, %v1252_v31 }
 0x236   :  { %v1429_v30 = vpop.eup %1428 }
 0x237   :  { %v557_v32 = vmul.f32 %v1429_v30, %v1252_v31  ;;  %v562_v35 = vsel %vm293_vm2, %v558_v34, 0.0 }
 0x239   :  { %v559_v33 = vsel %vm293_vm2, %v557_v32, 0.0 }
 0x23a   :  { %560 = vadd.xlane.f32.xlu0 %v559_v33 }
 0x23e   :  { %563 = vadd.xlane.f32.xlu0 %v562_v35 }
 0x254   :  { %907 = vrot.lane.b32.xlu0 %v281_v7, %s1686_s12 }
 0x2c3   :  { %v561_v36 = vpop.xlane.xlu0 %560 }
 0x2c7   :  { %v564_v37 = vpop.xlane.xlu0 %563 }
 0x2c8   :  { %v565_v38 = vmax.f32 %v561_v36, %v564_v37 }
 0x2ca   :  { %v566_v39 = vrot.slane %v565_v38, 4 }
 0x2cb   :  { %v908_v33 = vpop.permute.xlu0 %907 }
 0x2cc   :  { %v567_v40 = vmax.f32 %v565_v38, %v566_v39  ;;  %v929_v38 = vld [vmem:[#allocation19 + $0x10] sm:$0xff]  ;;  %v1081_v39 = vld [vmem:[%s2009_s17 + $0x8] sm:$0xff] }
 0x2ce   :  { %v568_v41 = vrot.slane %v567_v40, 2 }
 0x2d0   :  { %v569_v42 = vmax.f32 %v567_v40, %v568_v41  ;;  %v928_v40 = vld [vmem:[#allocation19 + $0x8] sm:$0xff]  ;;  %v927_v41 = vld [vmem:[#allocation19] sm:$0xff] }
 0x2d2   :  { %v570_v43 = vrot.slane %v569_v42, 1 }
 0x2d4   :  { %v571_v44 = vmax.f32 %v569_v42, %v570_v43  ;;  %v1080_v43 = vld [vmem:[%s2009_s17] sm:$0xff]  ;;  %s1689_s17 = smov [#allocation22]  }
 0x2d5   :  { %s1180_s25 = sshll.u32 %s1689_s17, 4  ;;  %s1181_s25 = int_to_ptr.vmem [resolvable:$true] %s1180_s25 }
 0x2d6   :  { %1403 = vpush %v571_v44  ;;  %s1612_s26 = scalar_lea.vmem %s1181_s25, 32  ;;  %p1617_p13 = scmp.lt.s32.totalorder %s1181_s25, %s1181_s25 }
 0x2d7   :  { %p1613_p12 = scmp.ne.s32.totalorder %s1181_s25, %s1612_s26  ;;  %p1618_p0 = scmp.lt.s32.totalorder %s1612_s26, %s1612_s26 }
 0x2d9   :  { %p1619_p1 = por %p1618_p0, %p1617_p13 }
 0x2db   :  { %p1620_p2 = pnand %p1619_p1, %p1613_p12 }
 0x307   :  { %s1404_s8 = spop %1403 }
 0x308   :  { %v573_v45 = vstv %s1404_s8 }
 0x309   :  { %v574_v46 = vsub.f32 %v561_v36, %v573_v45  ;;  %v575_v47 = vsub.f32 %v564_v37, %v573_v45  ;;  %v930_v37 = vld [vmem:[#allocation19 + $0x18] sm:$0xff] }
 0x30a   :  { %1386 = vmatpush3.msra.mxu1 %v930_v37 }
 0x30b   :  { %v576_v48 = vmul.f32 1.442695, %v574_v46  ;;  %v578_v49 = vmul.f32 1.442695, %v575_v47  ;;  %1387 = vmatprep.subr.mxu1 %v1683_v4 }
 0x30c   :  { %1388 = vmatpush3.msra.mxu1 %v929_v38 }
 0x30d   :  { %1430 = vpow2.f32 %v576_v48  ;;  %1389 = vmatprep.subr.mxu1 %v1683_v4 }
 0x30e   :  { %1432 = vpow2.f32 %v578_v49  ;;  %1390 = vmatpush3.msra.mxu1 %v928_v40 }
 0x30f   :  { %1391 = vmatprep.subr.mxu1 %v1683_v4 }
 0x310   :  { %1392 = vmatpush3.msra.mxu1 %v927_v41 }
 0x31a   :  { %v1431_v50 = vpop.eup %1430 }
 0x31b   :  { %v1433_v51 = vpop.eup %1432  ;;  %v581_v53 = vmul.f32 %v1431_v50, %v455_v17  ;;  %v1373_v17 = vpop.f32.mrf.mxu1 }
 0x31c   :  { %v582_v52 = vmul.f32 %v1433_v51, %v456_v22 }
 0x31e   :  { %1339 = vmatpush3.msra.mxu0 %v582_v52 }
 0x31f   :  { %1340 = vmatprep.subr.mxu0 %v1683_v4 }
 0x320   :  { %1341 = vmatpush3.msra.mxu0 %v581_v53 }
 0x321   :  { %1343 = vmatmul.mubr.msk.f32.vlgmr.msra.gmra.mxu0 %vm583_vm7, %v580_v54  ;;  %1345 = vmatprep.subr.mxu0 %v1683_v4 }
 0x322   :  { %1353 = vmatprep.mubr.msk.f32.mxu0 %vm1684_vm1, %v1683_v4  ;;  %1346 = vmatpush3.msra.mxu0 %v669_v57 }
 0x323   :  { %1347 = vmatprep.subr.mxu0 %v1683_v4 }
 0x324   :  { %1348 = vmatpush3.msra.mxu0 %v668_v59 }
 0x325   :  { %1349 = vmatprep.subr.mxu0 %v1683_v4 }
 0x326   :  { %1350 = vmatpush3.msra.mxu0 %v667_v62 }
 0x327   :  { %1351 = vmatprep.subr.mxu0 %v1683_v4 }
 0x328   :  { %1352 = vmatpush3.msra.mxu0 %v666_v3 }
 0x329   :  { %1374 = vmatprep.subr.mxu0 %v1683_v4 }
 0x3e1   :  { %v653_v0 = vpop.f32.mrf.mxu0 }
 0x3e2   :  { %1434 = vrcp.f32 %v653_v0 }
 0x3e3   :  { %v1344_v1 = vpop.f32.mrf.mxu0 }
 0x3ef   :  { %v1435_v6 = vpop.eup %1434 }
 0x3f0   :  { %660 = vperm.xlu1 %1424, %v1435_v6  }
 0x46b   :  { %v661_v11 = vpop.permute.xlu1 %660 }
 0x46c   :  { %v663_v12 = vmul.f32 %v661_v11, %v653_v0 }
 0x46e   :  { %1354 = vmatmul.mubr.msk.f32.vlgmr.msra.gmra.mxu0 %vm293_vm2, %v663_v12 }
 0x46f   :  { %1375 = vmatpush3.msra.mxu0 %v934_v13  ;;  %1382 = vmatprep.mubr.msk.f32.mxu0 %vm1684_vm1, %v1683_v4 }
 0x470   :  { %1376 = vmatprep.subr.mxu0 %v1683_v4 }
 0x471   :  { %1377 = vmatpush3.msra.mxu0 %v933_v14 }
 0x472   :  { %1378 = vmatprep.subr.mxu0 %v1683_v4 }
 0x473   :  { %1379 = vmatpush3.msra.mxu0 %v932_v9 }
 0x474   :  { %1380 = vmatprep.subr.mxu0 %v1683_v4 }
 0x475   :  { %1381 = vmatpush3.msra.mxu0 %v931_v15 }
 0x476   :  { %1383 = vmatmul.mubr.msk.f32.vlgmr.msra.gmra.mxu0 %vm293_vm2, %v663_v12  ;;  %1396 = vmatprep.subr.mxu0 %v1683_v4 }
 0x477   :  { %1400 = vmatprep.mubr.msk.f32.mxu0 %vm1684_vm1, %v1683_v4  ;;  %1397 = vmatpush3.msra.mxu0 %v1081_v39 }
 0x478   :  { %1398 = vmatprep.subr.mxu0 %v1683_v4 }
 0x479   :  { %1399 = vmatpush3.msra.mxu0 %v1080_v43 }
 0x47a   :  { %1401 = vmatmul.mubr.msk.f32.vlgmr.msra.gmra.mxu0 %vm583_vm7, %v1913_v60 }
 0x52e   :  { %v739_v18 = vpop.f32.mrf.mxu0 }
 0x52f   :  { %v813_v19 = vadd.f32 %v812_v8, %v739_v18 }
 0x530   :  { %v1355_v21 = vpop.f32.mrf.mxu0 }
 0x531   :  { %v890_v22 = vadd.f32 %v886_v16, %v813_v19 }
 0x533   :  { %v898_v23 = vadd.f32 %v1257_v20, %v890_v22 }
 0x535   :  { %1436 = vtanh.f32 %v898_v23  ;;  %v1258_v27 = vmul.f32 -1.442695, %v898_v23 }
 0x536   :  { %v1962_v24 = vpop.f32.mrf.mxu0 }
 0x537   :  { %1438 = vpow2.f32 %v1258_v27 }
 0x538   :  { %v1384_v25 = vpop.f32.mrf.mxu0 }
 0x53a   :  { %v1148_v49 = vpop.f32.mrf.mxu0 }
 0x53c   :  { %v1402_v50 = vpop.f32.mrf.mxu0 }
 0x542   :  { %v1437_v26 = vpop.eup %1436 }
 0x543   :  { %912 = vrot.lane.b32.xlu1 %v1437_v26, %s1687_s6 }
 0x544   :  { %v1439_v28 = vpop.eup %1438 }
 0x545   :  { %v902_v29 = vadd.f32 1.0, %v1439_v28 }
 0x547   :  { %1440 = vrcp.f32 %v902_v29 }
 0x554   :  { %v1441_v30 = vpop.eup %1440 }
 0x555   :  { %v910_v34 = vmul.f32 %v1441_v30, %v908_v33 }
 0x5b5   :  { %v913_v31 = vpop.permute.xlu1 %912 }
 0x5b6   :  { %v915_v32 = vmul.f32 %v1441_v30, %v913_v31 }
 0x5b8   :  { %917 = vrot.lane.b32.xlu1 %v915_v32, %s1686_s12 }
 0x62a   :  { %v918_v35 = vpop.permute.xlu1 %917 }
 0x62b   :  { %v920_v36 = vadd.f32 %v918_v35, %v910_v34 }
 0x62d   :  { %1442 = vtanh.f32 %v920_v36 }
 0x63a   :  { %v1443_v42 = vpop.eup %1442 }
 0x63b   :  { %923 = vrot.lane.b32.xlu1 %v1443_v42, %s1687_s6 }
 0x6ad   :  { %v924_v44 = vpop.permute.xlu1 %923 }
 0x6ae   :  { %v926_v45 = vmul.f32 %v1441_v30, %v924_v44 }
 0x6b0   :  { %1006 = vrot.lane.b32.xlu1 %v926_v45, %s1686_s12 }
 0x6b4   :  { %1165 = vrot.lane.b32.xlu1 %v920_v36, %s1688_s2 }
 0x722   :  { %v1007_v46 = vpop.permute.xlu1 %1006 }
 0x723   :  { %1163 = vst.msk [vmem:[#allocation4] sm:$0x3] %vm170_vm0, %v1007_v46  ;;  %v1170_v4 = vsel %vm293_vm2, %v1007_v46, %v920_v36  ;;  %1394 = vmatmul.mubr.msk.f32.vlgmr.msra.gmra.mxu1 %vm293_vm2, %v1007_v46 }
 0x724   :  { %v1172_v47 = vsel %vm1171_vm8, %v1170_v4, 0.0 }
 0x725   :  { %1173 = vst [vmem:[#allocation22] sm:$0x3] %v1172_v47 }
 0x726   :  { %v1166_v48 = vpop.permute.xlu1 %1165 }
 0x727   :  { %1168 = vst.msk [vmem:[#allocation5] sm:$0x3] %vm170_vm0, %v1166_v48 }
 0x728   :  { %1623 = shalt.err (!%p1620_p2)
}
 0x729   :  { %1183 = dma.vmem_to_hbm [thread:$0]  %s1181_s25, 32, %s2011_s19, [#allocation10]   ;;  %v1262_v53 = vld [vmem:[%s2010_s18] ss:$0 sm:$0xff] }
 0x72a   :  { %s1690_s28 = smov [#allocation23]  }
 0x72b   :  { %s1190_s4 = sshll.u32 %s1690_s28, 4  ;;  %s1191_s4 = int_to_ptr.vmem [resolvable:$true] %s1190_s4 }
 0x72c   :  { %s1632_s30 = scalar_lea.vmem %s1191_s4, 32  ;;  %p1637_p4 = scmp.lt.s32.totalorder %s1191_s4, %s1191_s4 }
 0x72d   :  { %p1633_p3 = scmp.ne.s32.totalorder %s1191_s4, %s1632_s30  ;;  %p1638_p5 = scmp.lt.s32.totalorder %s1632_s30, %s1632_s30 }
 0x72f   :  { %p1639_p6 = por %p1638_p5, %p1637_p4 }
 0x731   :  { %p1640_p7 = pnand %p1639_p6, %p1633_p3 }
 0x7e3   :  { %v1076_v51 = vpop.f32.mrf.mxu1 }
 0x7e4   :  { %v1077_v52 = vadd.f32 %v1076_v51, %v1962_v24 }
 0x7e5   :  { %v1395_v54 = vpop.f32.mrf.mxu1 }
 0x7e6   :  { %v1152_v55 = vadd.f32 %v1148_v49, %v1077_v52 }
 0x7e8   :  { %v1160_v56 = vadd.f32 %v1262_v53, %v1152_v55 }
 0x7ea   :  { %1169 = vst [vmem:[#allocation23] sm:$0x3] %v1160_v56 }
 0x7eb   :  { %1643 = shalt.err (!%p1640_p7)
}
 0x7ec   :  { %1193 = dma.vmem_to_hbm [thread:$0]  %s1191_s4, 32, %s2012_s20, [#allocation24]  }
 0x7ed   :  { %1668 = dma.done.wait [#allocation10], 32  }
 0x7ee   :  { %1669 = vsyncadd [#allocation10], 4294967264 }
 0x7ef   :  { %1670 = dma.done.wait [#allocation24], 32  }
 0x7f0   :  { %1671 = vsyncadd [#allocation24], 4294967264 }
 0x7f1   :  { %1200 = vsyncpa [#allocation9], 1 }
 0x7f2   :  { %1201 = vsyncpa [#allocation12], 1 }
 0x7f3   :  { %1202 = vsyncpa [#allocation15], 1 }
 0x7f4   :  { %1203 = vsyncpa [#allocation18], 1 }
 0x7f5   :  { %1204 = vsyncpa [#allocation21], 1 }
 0x7f6   :  { %1205 = vsyncpa [#allocation10], 1 }
 0x7f7   :  { %1206 = vsyncpa [#allocation24], 1 }
 0x7f8   :  { %1207 = vsyncmov [#allocation3] }
 0x7fb   :  { %s1208_s18 = vpop.sfrf %1207 }
 0x7fc   :  { %p1263_p8 = scmp.ne.s32.totalorder %s1208_s18, 0 }
 0x7fe   :  { %1212 = shalt.err (%p1263_p8)  }
 0x7ff   :  { %1214 = vsyncmov [#allocation3 + $0x1] }
 0x802   :  { %s1215_s10 = vpop.sfrf %1214 }
 0x803   :  { %p1264_p9 = scmp.ne.s32.totalorder %s1215_s10, 0 }
 0x805   :  { %1219 = shalt.err (%p1264_p9)  }

</bundles_post_ra>
